<compile_context>
chip_gen: v7x
topology: tpu7x:2x2x1
jax: 0.10.0
libtpu: 0.0.40
codegen_flags: <defaults>
</compile_context>

<pallas_src>
import jax
import jax.numpy as jnp
import numpy as np
from jax.experimental import pallas as pl
from jax.experimental.pallas import tpu as pltpu


def _channel_shuffle_kernel(x_ref, o_ref):
    # x_ref: (groups, C2, HW)   o_ref: (C2, groups * HW)
    groups, c2, hw = x_ref.shape
    # Static 2-iteration unroll (groups == 2).  Each store is a contiguous
    # lane slab: no sublane permutation, no reshape relayout.
    for g in range(groups):
        o_ref[:, g * hw:(g + 1) * hw] = x_ref[g]


def channel_shuffle_transpose(x, groups=2):
    """Equivalent of x.view(B, groups, C//groups, H, W).transpose(1, 2)."""
    B, C, H, W = x.shape
    assert C % groups == 0
    C2 = C // groups
    HW = H * W

    # Glue: collapse spatial dims so the kernel sees a lane-dense last axis.
    x4 = x.reshape(B, groups, C2, HW)

    out = pl.pallas_call(
        _channel_shuffle_kernel,
        out_shape=jax.ShapeDtypeStruct((B, C2, groups * HW), x.dtype),
        grid=(B,),
        in_specs=[
            # Batch dim squeezed; remaining block equals the full extents,
            # satisfying the (8, 128) / full-dim rule.
            pl.BlockSpec((None, groups, C2, HW), lambda b: (b, 0, 0, 0)),
        ],
        out_specs=pl.BlockSpec((None, C2, groups * HW), lambda b: (b, 0, 0)),
        compiler_params=pltpu.CompilerParams(
            dimension_semantics=("parallel",),
        ),
    )(x4)

    # Glue: splitting the last dim (groups*HW -> groups, H, W) is free; this
    # matches torch.transpose(x.view(B, groups, C2, H, W), 1, 2).
    return out.reshape(B, C2, groups, H, W)


def _reference(x, groups=2):
    B, C, H, W = x.shape
    C2 = C // groups
    return jnp.transpose(x.reshape(B, groups, C2, H, W), (0, 2, 1, 3, 4))


if __name__ == "__main__":
    key = jax.random.PRNGKey(0)

    # Small shapes consistent with the module (original was [1, 704, 7, 7]).
    B, C, H, W = 2, 16, 7, 7
    x = jax.random.normal(key, (B, C, H, W), dtype=jnp.float32)

    y = channel_shuffle_transpose(x, groups=2)
    y = jax.block_until_ready(y)

    ref = _reference(x, groups=2)
    assert y.shape == (B, C // 2, 2, H, W), y.shape
    np.testing.assert_allclose(np.asarray(y), np.asarray(ref), rtol=0, atol=0)

    # Production-like shape from the module spec: [1, 704, 7, 7].
    x_big = jax.random.normal(jax.random.PRNGKey(1), (1, 704, 7, 7),
                              dtype=jnp.float32)
    y_big = jax.block_until_ready(channel_shuffle_transpose(x_big, groups=2))
    np.testing.assert_allclose(np.asarray(y_big),
                               np.asarray(_reference(x_big, groups=2)),
                               rtol=0, atol=0)

    print("KERNEL_OK")
</pallas_src>

<mosaic_0001>
module attributes {stable_mosaic.version = 11 : i64} {
  func.func @_channel_shuffle_kernel(%arg0: i32, %arg1: memref<1x2x8x49xf32, #tpu.memory_space<vmem>>, %arg2: memref<1x8x98xf32, #tpu.memory_space<vmem>>) attributes {dimension_semantics = [#tpu.dimension_semantics<parallel>], iteration_bounds = array<i64: 2>, scalar_prefetch = 0 : i64, scratch_operands = 0 : i64, tpu.core_type = #tpu.core_type<tc>, window_params = [{transform_indices = @transform_0, window_bounds = array<i64: 1, 2, 8, 49>}, {transform_indices = @transform_1, window_bounds = array<i64: 1, 8, 98>}]} {
    %c0 = arith.constant 0 : index
    %c0_0 = arith.constant 0 : index
    %c0_1 = arith.constant 0 : index
    %c0_2 = arith.constant 0 : index
    %0 = vector.load %arg1[%c0, %c0_0, %c0_1, %c0_2] : memref<1x2x8x49xf32, #tpu.memory_space<vmem>>, vector<1x1x8x49xf32>
    %1 = vector.shape_cast %0 : vector<1x1x8x49xf32> to vector<8x49xf32>
    %c0_3 = arith.constant 0 : index
    %c0_4 = arith.constant 0 : index
    %c0_5 = arith.constant 0 : index
    %2 = vector.load %arg2[%c0_3, %c0_4, %c0_5] : memref<1x8x98xf32, #tpu.memory_space<vmem>>, vector<1x8x49xf32>
    %3 = vector.shape_cast %2 : vector<1x8x49xf32> to vector<8x49xf32>
    %4 = vector.shape_cast %1 : vector<8x49xf32> to vector<1x8x49xf32>
    tpu.vector_store %arg2[%c0_3, %c0_4, %c0_5], %4 {strides = array<i32>} : memref<1x8x98xf32, #tpu.memory_space<vmem>>, vector<1x8x49xf32>,
    %c0_6 = arith.constant 0 : index
    %c1 = arith.constant 1 : index
    %c0_7 = arith.constant 0 : index
    %c0_8 = arith.constant 0 : index
    %5 = vector.load %arg1[%c0_6, %c1, %c0_7, %c0_8] : memref<1x2x8x49xf32, #tpu.memory_space<vmem>>, vector<1x1x8x49xf32>
    %6 = vector.shape_cast %5 : vector<1x1x8x49xf32> to vector<8x49xf32>
    %c0_9 = arith.constant 0 : index
    %c0_10 = arith.constant 0 : index
    %c49 = arith.constant 49 : index
    %7 = vector.load %arg2[%c0_9, %c0_10, %c49] : memref<1x8x98xf32, #tpu.memory_space<vmem>>, vector<1x8x49xf32>
    %8 = vector.shape_cast %7 : vector<1x8x49xf32> to vector<8x49xf32>
    %9 = vector.shape_cast %6 : vector<8x49xf32> to vector<1x8x49xf32>
    tpu.vector_store %arg2[%c0_9, %c0_10, %c49], %9 {strides = array<i32>} : memref<1x8x98xf32, #tpu.memory_space<vmem>>, vector<1x8x49xf32>,
    return
  }
  func.func @transform_0(%arg0: i32) -> (i32, i32, i32, i32) {
    %c0_i32 = arith.constant 0 : i32
    %c0_i32_0 = arith.constant 0 : i32
    %c0_i32_1 = arith.constant 0 : i32
    %c0_i32_2 = arith.constant 0 : i32
    return %arg0, %c0_i32, %c0_i32_0, %c0_i32_1 : i32, i32, i32, i32
  }
  func.func @transform_1(%arg0: i32) -> (i32, i32, i32) {
    %c0_i32 = arith.constant 0 : i32
    %c0_i32_0 = arith.constant 0 : i32
    %c0_i32_1 = arith.constant 0 : i32
    return %arg0, %c0_i32, %c0_i32_0 : i32, i32, i32
  }
}

</mosaic_0001>

<bundles_post_ra>
// kernel: tpu_custom_call.1
= control target key start
LH: loop header
LB: loop body
LE: loop exit
PB: predicated region body
PF: predicated region fallthrough
CT: control target
= control target key end

     0   :  { %6 = vsyncpa [#allocation3], 0  ;;  %s568_s0 = inlined_call_operand.hbm [shape: f32[2,2,8,49], index: 0, kind: input, shape index: {}]   ;;  %s569_s1 = inlined_call_operand.hbm [shape: f32[2,8,98], index: 1, kind: output, shape index: {}]  }
   0x1   :  { %8 = vsyncpa [#allocation3 + $0x1], 0 }
   0x2   :  { %9 = vsyncpa [#allocation4], 0 }
   0x3   :  { %11 = vsyncpa [#allocation4 + $0x1], 0  ;;  %s407_s6 = smov 0   ;;  %s409_s7 = smov 0  }
   0x4   :  { %s411_s8 = smov 0   ;;  %s413_s9 = smov 0  }
   0x5 LB: > { %s428_s10 = sadd.s32 4294967295, %s390_s9   ;;  %s230_s11 = sadd.s32 4294967294, %s390_s9   ;;  %s390_s9 = sphi %s413_s9, %s582_s9   ;;  %s386_s8 = sphi %s411_s8, %s581_s8   ;;  %s382_s7 = sphi %s409_s7, %s580_s7   ;;  %s378_s6 = sphi %s407_s6, %s579_s6  }
   0x6   : > { %s432_s12 = sadd.s32 1, %s390_s9   ;;  %s24_s13 = sadd.s32 1, %s386_s8 }
   0x7   : > { %s21_s14 = ssub.s32 %s390_s9, %s432_s12  ;;  %p31_p0 = scmp.ne.s32.totalorder %s386_s8, %s382_s7 }
   0x8   : > { %p22_p1 = scmp.eq.s32.totalorder %s21_s14, 0  ;;  %p32_p2 = scmp.eq.s32.totalorder %s390_s9, 0 }
   0x9   : > { %p37_p3 = scmp.ne.s32.totalorder %s382_s7, %s378_s6  ;;  %p38_p4 = scmp.eq.s32.totalorder %s428_s10, 0 }
   0xa   : > { %s444_s15 = scalar_select %p22_p1, %s386_s8, %s24_s13  }
   0xb   : > { %p446_p5 = por %p32_p2, %p31_p0  ;;  %p450_p6 = por %p38_p4, %p37_p3 }
   0xc   : > { %p61_p7 = scmp.eq.s32.totalorder %s428_s10, 1  ;;  %p67_p8 = scmp.eq.s32.totalorder %s230_s11, 1 }
   0xd   : > { %p257_p10 = scmp.lt.s32.totalorder %s390_s9, 2  ;;  %s87_s20 = sand.u32 1, %s386_s8  }
   0xe   : > { %p457_p11 = por %p61_p7, %p31_p0  ;;  %p461_p12 = por %p67_p8, %p37_p3 }
   0xf   : > { %s244_s21 = sshll.u32 %s390_s9, 8  ;;  %s233_s22 = sshll.u32 %s87_s20, 4 }
  0x10   : > { %s573_s18 = scalar_select %p457_p11, 1, 0 }
  0x11   : > { %s574_s19 = scalar_select %p461_p12, 1, 0 }
  0x12   : > { %s470_s25 = scalar_lea.hbm %s568_s0, %s244_s21  ;;  %s91_s26 = scalar_lea.vmem [#allocation2], %s233_s22 }
  0x13   : > { %s98_s27 = sshll.u32 %s91_s26, 4  ;;  %p474_p13 = pnand %p257_p10, %p446_p5  ;;  %s478_s27 = int_to_ptr.vmem [resolvable:$true] %s98_s27 }
  0x14   : > { %s480_s29 = scalar_lea.sflag [#allocation3], %s87_s20  ;;  %s294_s30 = scalar_lea.hbm %s470_s25, 256 }
  0x15   : > { %p295_p0 = scmp.ne.s32.totalorder %s470_s25, %s294_s30  ;;  %p296_p1 = pneg %p474_p13 }
  0x16   : > { %s299_s4 = scalar_lea.hbm %s568_s0, 512  ;;  %p300_p4 = scmp.lt.u32.totalorder %s470_s25, %s568_s0 }
  0x17   : > { %p297_p2 = pnand %p296_p1, %p295_p0  ;;  %p301_p5 = scmp.lt.u32.totalorder %s299_s4, %s294_s30 }
  0x18   : > { %p303_p8 = scmp.lt.u32.totalorder %s294_s30, %s470_s25 }
  0x19   : > { %p298_p3 = pneg %p297_p2  ;;  %p302_p7 = por %p301_p5, %p300_p4 }
  0x1b   : > { %p304_p10 = por %p303_p8, %p302_p7 }
  0x1d   : > { %p305_p9 = pnand %p304_p10, %p298_p3 }
  0x1f   : > { %308 = shalt.err (!%p305_p9)
}
  0x20   : > { %s309_s13 = scalar_lea.vmem %s478_s27, 256  ;;  %s392_s14 = smov [#allocation2]  }
  0x21   : > { %p310_p0 = scmp.ne.s32.totalorder %s478_s27, %s309_s13  ;;  %s314_s16 = sshll.u32 %s392_s14, 4  ;;  %s315_s16 = int_to_ptr.vmem [resolvable:$false] %s314_s16 }
  0x22   : > { %s316_s20 = scalar_lea.vmem %s315_s16, 512  ;;  %p317_p11 = scmp.lt.s32.totalorder %s478_s27, %s315_s16 }
  0x23   : > { %p312_p2 = pnand %p310_p0, %p296_p1  ;;  %p318_p4 = scmp.lt.s32.totalorder %s316_s20, %s309_s13 }
  0x25   : > { %p313_p12 = pneg %p312_p2  ;;  %p319_p5 = por %p318_p4, %p317_p11 }
  0x27   : > { %p320_p7 = pnand %p319_p5, %p313_p12 }
  0x29   : > { %323 = shalt.err (!%p320_p7)
}
  0x2a   : > { %s393_s21 = smov 128   ;;  %s394_s22 = smov 8  }
  0x2b   : > { %252 = dma.hbm_to_vmem [thread:$0]  (!%p474_p13), %s470_s25, 256, %s478_s27, %s480_s29, %s393_s21, %s393_s21, %s394_s22  }
  0x2c   : > { %p236_p9 = scmp.ge.s32.totalorder %s390_s9, 1  ;;  %p106_p1 = scmp.lt.s32.totalorder %s390_s9, 3 }
  0x2e   : > { %p107_p3 = pnand %p236_p9, %p106_p1 }
  0x2f   : > { %s511_s23 = sand.u32 (!%p107_p3), 1, %s382_s7  }
  0x30   : > { %110 = sbr.rel (%p107_p3) target bundleno = 186 (0xba), region = 24  ;;  %s237_s24 = sshll.u32 (!%p107_p3), %s511_s23, 4 }
  0x31   : > { %s113_s26 = scalar_lea.sflag (!%p107_p3), [#allocation3], %s511_s23  ;;  %s116_s30 = scalar_lea.vmem (!%p107_p3), [#allocation2], %s237_s24 }
  0x37   : > { %369 = dma.done.wait (%p450_p6), %s113_s26, 256  }
  0x38   : > { %371 = vsyncadd (%p450_p6), %s113_s26, 4294967040  ;;  %s238_s25 = sshll.u32 %s511_s23, 3  ;;  %vm136_vm0 = vcmask 400384   ;;  %v135_v0 = vld [vmem:[%s116_s30] sm:$0xff]  ;;  %v239_v1 = vld [vmem:[%s116_s30 + $0x8] sm:$0xff]  ;;  %s395_s28 = smov 49  }
  0x39   : > { %s134_s27 = scalar_lea.vmem [#allocation5], %s238_s25  ;;  %141 = vrot.lane.b32.xlu0 %v239_v1, %s395_s28  ;;  %s241_s29 = sshll.u32 %s428_s10, 7  ;;  %vm144_vm1 = vcmask 802184  }
  0x3a   : > { %137 = vst.msk [vmem:[%s134_s27] sm:$0xff] %vm136_vm0, %v135_v0  ;;  %s160_s2 = sshll.u32 %s134_s27, 4  ;;  %s524_s17 = scalar_lea.hbm %s569_s1, %s241_s29  ;;  %s526_s2 = int_to_ptr.vmem [resolvable:$true] %s160_s2 }
  0x3b   : > { %s147_s5 = scalar_lea.sflag [#allocation4], %s511_s23  ;;  %s324_s11 = scalar_lea.vmem %s526_s2, 128 }
  0x3c   : > { %p325_p6 = scmp.ne.s32.totalorder %s526_s2, %s324_s11  ;;  %p576_p11 = scmp.ne.s32.totalorder %s573_s18, 0 }
  0x3d   : > { %s396_s10 = smov [#allocation5]  }
  0x3e   : > { %p326_p12 = pnand %p325_p6, %p576_p11  ;;  %s328_s13 = sshll.u32 %s396_s10, 4  ;;  %s329_s13 = int_to_ptr.vmem [resolvable:$false] %s328_s13 }
  0x3f   : > { %s330_s14 = scalar_lea.vmem %s329_s13, 256  ;;  %p331_p8 = scmp.lt.s32.totalorder %s526_s2, %s329_s13 }
  0x40   : > { %p327_p13 = pneg %p326_p12  ;;  %p332_p10 = scmp.lt.s32.totalorder %s330_s14, %s324_s11 }
  0x42   : > { %p333_p0 = por %p332_p10, %p331_p8 }
  0x44   : > { %p334_p2 = pnand %p333_p0, %p327_p13 }
  0xab   : > { %v142_v2 = vpop.permute.xlu0 %141 }
  0xac   : > { %145 = vst.msk [vmem:[%s134_s27] sm:$0xff] %vm144_vm1, %v142_v2 }
  0xad   : > { %337 = shalt.err (!%p334_p2)
}
  0xae   : > { %s338_s16 = scalar_lea.hbm %s524_s17, 128  ;;  %s342_s22 = scalar_lea.hbm %s569_s1, 256 }
  0xaf   : > { %p339_p4 = scmp.ne.s32.totalorder %s524_s17, %s338_s16  ;;  %p343_p9 = scmp.lt.u32.totalorder %s524_s17, %s569_s1 }
  0xb0   : > { %p344_p1 = scmp.lt.u32.totalorder %s342_s22, %s338_s16  ;;  %p346_p6 = scmp.lt.u32.totalorder %s338_s16, %s524_s17 }
  0xb1   : > { %p340_p5 = pnand %p339_p4, %p576_p11 }
  0xb2   : > { %p345_p3 = por %p344_p1, %p343_p9 }
  0xb3   : > { %p341_p7 = pneg %p340_p5 }
  0xb4   : > { %p347_p12 = por %p346_p6, %p345_p3 }
  0xb6   : > { %p348_p13 = pnand %p347_p12, %p341_p7 }
  0xb8   : > { %351 = shalt.err (!%p348_p13)
}
  0xb9   : > { %247 = dma.vmem_to_hbm [thread:$0]  (%p576_p11), %s526_s2, 128, %s524_s17, %s147_s5  }
  0xba PF: > { %s172_s26 = sand.u32 1, %s378_s6   ;;  %p577_p8 = scmp.ne.s32.totalorder %s574_s19, 0 }
  0xbb   : > { %p578_p10 = scmp.ge.s32.totalorder %s390_s9, 2  ;;  %s173_s30 = scalar_lea.sflag [#allocation4], %s172_s26 }
  0xbd   : > { %p254_p0 = pnand %p578_p10, %p577_p8 }
  0xbf   : > { %373 = dma.done.wait (!%p254_p0), %s173_s30, 128  }
  0xc0   : > { %375 = vsyncadd (!%p254_p0), %s173_s30, 4294967168  ;;  %p14_p2 = scmp.ge.s32.totalorder %s432_s12, 4   ;;  %s579_s6 = smov %s382_s7 }
  0xc1   : > { %s580_s7 = smov %s386_s8  ;;  %s581_s8 = smov %s444_s15 }
  0xc2   : > { %s582_s9 = smov %s432_s12  ;;  %16 = sbr.rel (!%p14_p2) target bundleno = 5 (0x5), region = 70 }
  0xc9   :  { %178 = vsyncpa [#allocation3], 1 }
  0xca   :  { %180 = vsyncpa [#allocation3 + $0x1], 1 }
  0xcb   :  { %181 = vsyncpa [#allocation4], 1 }
  0xcc   :  { %183 = vsyncpa [#allocation4 + $0x1], 1 }

</bundles_post_ra>
